<compile_context>
chip_gen: v5e
topology: v5e:2x2
jax: 0.10.0
libtpu: 0.0.40
codegen_flags: <defaults>
</compile_context>

<pallas_src>
import jax
import jax.numpy as jnp
from jax.experimental import pallas as pl
from jax.experimental.pallas import tpu as pltpu


MAX_ROW_TILE = 2048  # per-tile VMEM here is < 1 MiB, so big tiles are safe on all generations


# --------------------------------------------------------------------------------------
# Small helpers
# --------------------------------------------------------------------------------------
def _round_up(x, m):
    return ((x + m - 1) // m) * m


def _pad_axis(x, axis, new_size):
    if x.shape[axis] == new_size:
        return x
    pads = [(0, 0)] * x.ndim
    pads[axis] = (0, new_size - x.shape[axis])
    return jnp.pad(x, pads)


def _pick_row_tile(m, max_tile=MAX_ROW_TILE):
    """Row tile that is a multiple of 8, yields >=2 grid steps whenever m > 8 (feeds both
    v7x TensorCores), caps at max_tile, and avoids ~2x padding on awkward row counts."""
    m8 = _round_up(max(m, 1), 8)
    tm = min(max_tile, _round_up(pl.cdiv(m8, 2), 8))
    tm = max(tm, 8)
    return tm, pl.cdiv(m8, tm) * tm


# --------------------------------------------------------------------------------------
# Pallas kernels
# --------------------------------------------------------------------------------------
def _tsformer_pool_kernel(x_ref, w0_ref, b0_ref, w1_ref, b1_ref, w2_ref, b2_ref,
                          mean_ref, last_ref, acc_ref):
    # Fused patch-embedding + 2-layer MLP encoder + patch-mean + last-patch extraction.
    # Grid = (row_tiles, P); the mean accumulator lives in VMEM scratch so the per-patch
    # hidden states never touch HBM.
    p = pl.program_id(1)
    n_p = pl.num_programs(1)
    x = x_ref[0].astype(jnp.bfloat16)                                    # [tm, Lp]
    h = jnp.dot(x, w0_ref[...], preferred_element_type=jnp.float32) + b0_ref[...]
    h = jnp.maximum(jnp.dot(h.astype(jnp.bfloat16), w1_ref[...],
                            preferred_element_type=jnp.float32) + b1_ref[...], 0.0)
    h = jnp.dot(h.astype(jnp.bfloat16), w2_ref[...],
                preferred_element_type=jnp.float32) + b2_ref[...]        # [tm, D]

    @pl.when(p == 0)
    def _():
        acc_ref[...] = jnp.zeros_like(acc_ref)

    acc_ref[...] += h

    @pl.when(p == n_p - 1)
    def _():
        mean_ref[...] = acc_ref[...] * (1.0 / n_p)
        last_ref[...] = h


def _node_proj_kernel(x_ref, nw_ref, nb_ref, wrs_ref, brs_ref, o_ref):
    # Fused node-feature projection + receiver|sender projections as one [D, 2D] matmul.
    feat = jnp.maximum(
        jnp.dot(x_ref[...].astype(jnp.bfloat16), nw_ref[...],
                preferred_element_type=jnp.float32) + nb_ref[...], 0.0)
    o_ref[...] = jnp.dot(feat.astype(jnp.bfloat16), wrs_ref[...],
                         preferred_element_type=jnp.float32) + brs_ref[...]


def _pairwise_prob_kernel(fr_ref, fst_ref, wd_ref, bd_ref, o_ref):
    # hcat[i, j] = relu(fr[i] + fs[j]); prob[i, j] = sigmoid(hcat @ (w0-w1) + (b0-b1))
    # == softmax([l0, l1])[..., 0] of the original 2-class head.
    # Layout: nodes (j) on the lane axis, D on sublanes -> lane-dense stores and VPU work.
    fr = fr_ref[0]                                                       # [TI, D]
    fst = fst_ref[0]                                                     # [D, TJ]
    h = jnp.maximum(fr[:, :, None] + fst[None, :, :], 0.0)              # [TI, D, TJ]
    logit = jnp.sum(h * wd_ref[...][None, :, :], axis=1) + bd_ref[...]  # [TI, TJ]
    # sigmoid via EUP (exp) + approximate reciprocal; clamp to keep a valid probability.
    prob = pl.reciprocal(1.0 + jnp.exp(-logit), approx=True)
    o_ref[0] = jnp.clip(prob, 0.0, 1.0)


def _cosine_sim_kernel(x_ref, o_ref):
    # Cosine similarity of mean-pooled node representations (normalize f32, matmul bf16).
    x = x_ref[0]                                                         # [Np, D]
    nrm = jnp.sqrt(jnp.sum(x * x, axis=-1, keepdims=True))
    xn = (x / (nrm + 1e-6)).astype(jnp.bfloat16)
    o_ref[0] = jax.lax.dot_general(xn, xn, (((1,), (1,)), ((), ())),
                                   preferred_element_type=jnp.float32)


def _gwnet_kernel(xs_ref, h_ref, a_ref, sw_ref, sb_ref, hw_ref, hb_ref,
                  mw_ref, mb_ref, ew_ref, eb_ref, o_ref):
    # Entire GraphWaveNet backend for one batch element; all H-wide intermediates stay in
    # VMEM.  Mix stage is a single K=3H matmul against the original [3H, H] weight.
    xs = xs_ref[0].astype(jnp.bfloat16)                                  # [N, L*C]
    hh = h_ref[0].astype(jnp.bfloat16)                                   # [N, D]
    adj = a_ref[0]                                                       # [N, N] bf16
    x0 = jnp.maximum(jnp.dot(xs, sw_ref[...],
                             preferred_element_type=jnp.float32) + sb_ref[...], 0.0)
    hp = jnp.dot(hh, hw_ref[...], preferred_element_type=jnp.float32) + hb_ref[...]
    x0b = x0.astype(jnp.bfloat16)
    ax = jnp.dot(adj, x0b, preferred_element_type=jnp.float32)           # graph conv A @ X
    cat = jnp.concatenate(
        [x0b, ax.astype(jnp.bfloat16), hp.astype(jnp.bfloat16)], axis=-1)  # [N, 3H]
    z = jnp.maximum(jnp.dot(cat, mw_ref[...],
                            preferred_element_type=jnp.float32) + mb_ref[...], 0.0)
    o_ref[0] = jnp.dot(z.astype(jnp.bfloat16), ew_ref[...],
                       preferred_element_type=jnp.float32) + eb_ref[...]


# --------------------------------------------------------------------------------------
# Pallas wrappers
# --------------------------------------------------------------------------------------
def tsformer_pooled(x_pml, pe_w, pe_b, w1, b1, w2, b2):
    """x_pml:[P, M, Lp] -> (patch-mean [M, D], last-patch [M, D]) without materializing the
    full [M, P, D] hidden states in HBM."""
    P, M, Lp = x_pml.shape
    D = pe_w.shape[1]
    tm, Mp = _pick_row_tile(M)
    xp = _pad_axis(x_pml, 1, Mp)
    pe_w = pe_w.astype(jnp.bfloat16)
    w1 = w1.astype(jnp.bfloat16)
    w2 = w2.astype(jnp.bfloat16)
    mean_h, last_h = pl.pallas_call(
        _tsformer_pool_kernel,
        out_shape=(jax.ShapeDtypeStruct((Mp, D), jnp.float32),
                   jax.ShapeDtypeStruct((Mp, D), jnp.float32)),
        grid=(Mp // tm, P),
        in_specs=[
            pl.BlockSpec((1, tm, Lp), lambda i, p: (p, i, 0)),
            pl.BlockSpec(pe_w.shape, lambda i, p: (0, 0)),
            pl.BlockSpec(pe_b.shape, lambda i, p: (0, 0)),
            pl.BlockSpec(w1.shape, lambda i, p: (0, 0)),
            pl.BlockSpec(b1.shape, lambda i, p: (0, 0)),
            pl.BlockSpec(w2.shape, lambda i, p: (0, 0)),
            pl.BlockSpec(b2.shape, lambda i, p: (0, 0)),
        ],
        out_specs=(pl.BlockSpec((tm, D), lambda i, p: (i, 0)),
                   pl.BlockSpec((tm, D), lambda i, p: (i, 0))),
        scratch_shapes=[pltpu.VMEM((tm, D), jnp.float32)],
        compiler_params=pltpu.CompilerParams(
            dimension_semantics=("parallel", "arbitrary")),
    )(xp, pe_w, pe_b, w1, b1, w2, b2)
    return mean_h[:M], last_h[:M]


def node_pair_proj(x, node_w, node_b, cat1_w, cat1_b):
    """x:[M, D] -> (fr:[M, D], fs:[M, D]); node projection fused with concat(recv|send)."""
    M, D = x.shape
    wrs = jnp.concatenate([cat1_w[:D], cat1_w[D:]], axis=1).astype(jnp.bfloat16)  # [D, 2D]
    brs = jnp.concatenate([cat1_b, jnp.zeros_like(cat1_b)], axis=1)               # [1, 2D]
    node_w = node_w.astype(jnp.bfloat16)
    tm, Mp = _pick_row_tile(M)
    xp = _pad_axis(x, 0, Mp)
    out = pl.pallas_call(
        _node_proj_kernel,
        out_shape=jax.ShapeDtypeStruct((Mp, 2 * D), jnp.float32),
        grid=(Mp // tm,),
        in_specs=[
            pl.BlockSpec((tm, D), lambda i: (i, 0)),
            pl.BlockSpec(node_w.shape, lambda i: (0, 0)),
            pl.BlockSpec(node_b.shape, lambda i: (0, 0)),
            pl.BlockSpec(wrs.shape, lambda i: (0, 0)),
            pl.BlockSpec(brs.shape, lambda i: (0, 0)),
        ],
        out_specs=pl.BlockSpec((tm, 2 * D), lambda i: (i, 0)),
        compiler_params=pltpu.CompilerParams(dimension_semantics=("parallel",)),
    )(xp, node_w, node_b, wrs, brs)
    out = out[:M]
    return out[:, :D], out[:, D:]


def pairwise_bernoulli_prob(fr, fs, wd, bd):
    """fr, fs:[B, N, D], wd:[D, 1], bd:[1, 1] -> prob:[B, N, N].

    fs is transposed so the node axis sits on lanes; both node axes are grid-tiled so the
    [TI, D, TJ] intermediate stays ~1 MiB regardless of N."""
    B, N, D = fr.shape
    Np = _round_up(N, 128) if N > 128 else _round_up(N, 8)
    ti = min(64, Np)
    tj = min(128, Np)
    fr_p = _pad_axis(fr, 1, Np)
    fst_p = jnp.transpose(_pad_axis(fs, 1, Np), (0, 2, 1))               # [B, D, Np]
    out = pl.pallas_call(
        _pairwise_prob_kernel,
        out_shape=jax.ShapeDtypeStruct((B, Np, Np), jnp.float32),
        grid=(B, Np // ti, Np // tj),
        in_specs=[
            pl.BlockSpec((1, ti, D), lambda b, i, j: (b, i, 0)),
            pl.BlockSpec((1, D, tj), lambda b, i, j: (b, 0, j)),
            pl.BlockSpec((D, 1), lambda b, i, j: (0, 0)),
            pl.BlockSpec((1, 1), lambda b, i, j: (0, 0)),
        ],
        out_specs=pl.BlockSpec((1, ti, tj), lambda b, i, j: (b, i, j)),
        compiler_params=pltpu.CompilerParams(
            dimension_semantics=("parallel", "parallel", "parallel")),
    )(fr_p, fst_p, wd, bd)
    return out[:, :N, :N]


def cosine_similarity(node_repr):
    """node_repr:[B, N, D] (patch-mean hidden states) -> sim:[B, N, N]."""
    B, N, D = node_repr.shape
    Np = _round_up(N, 8)
    xp = _pad_axis(node_repr, 1, Np)
    sim = pl.pallas_call(
        _cosine_sim_kernel,
        out_shape=jax.ShapeDtypeStruct((B, Np, Np), jnp.float32),
        grid=(B,),
        in_specs=[pl.BlockSpec((1, Np, D), lambda b: (b, 0, 0))],
        out_specs=pl.BlockSpec((1, Np, Np), lambda b: (b, 0, 0)),
        compiler_params=pltpu.CompilerParams(dimension_semantics=("parallel",)),
    )(xp)
    return sim[:, :N, :N]


def graph_wavenet_backend(xs, hidden_last, sampled_adj, params, L):
    """xs:[B, N, L*C], hidden_last:[B, N, D], sampled_adj:[B, N, N] -> y_hat:[B, N, L]."""
    B, N, LC = xs.shape
    D = hidden_last.shape[-1]
    Np = _round_up(N, 8)
    xs_p = _pad_axis(xs, 1, Np)
    h_p = _pad_axis(hidden_last, 1, Np)
    adj_p = _pad_axis(_pad_axis(sampled_adj, 1, Np), 2, Np).astype(jnp.bfloat16)
    sw = params["start_w"].astype(jnp.bfloat16)
    hw = params["hid_w"].astype(jnp.bfloat16)
    mw = params["mix_w"].astype(jnp.bfloat16)
    ew = params["end_w"].astype(jnp.bfloat16)
    # TODO(synk): for very large N, add a row-tile grid axis over x0/z (adj resident) to
    #             bound VMEM and expose more parallel steps; grid=(B,) suffices here.
    out = pl.pallas_call(
        _gwnet_kernel,
        out_shape=jax.ShapeDtypeStruct((B, Np, L), jnp.float32),
        grid=(B,),
        in_specs=[
            pl.BlockSpec((1, Np, LC), lambda b: (b, 0, 0)),
            pl.BlockSpec((1, Np, D), lambda b: (b, 0, 0)),
            pl.BlockSpec((1, Np, Np), lambda b: (b, 0, 0)),
            pl.BlockSpec(sw.shape, lambda b: (0, 0)),
            pl.BlockSpec(params["start_b"].shape, lambda b: (0, 0)),
            pl.BlockSpec(hw.shape, lambda b: (0, 0)),
            pl.BlockSpec(params["hid_b"].shape, lambda b: (0, 0)),
            pl.BlockSpec(mw.shape, lambda b: (0, 0)),
            pl.BlockSpec(params["mix_b"].shape, lambda b: (0, 0)),
            pl.BlockSpec(ew.shape, lambda b: (0, 0)),
            pl.BlockSpec(params["end_b"].shape, lambda b: (0, 0)),
        ],
        out_specs=pl.BlockSpec((1, Np, L), lambda b: (b, 0, 0)),
        compiler_params=pltpu.CompilerParams(dimension_semantics=("parallel",)),
    )(xs_p, h_p, adj_p, sw, params["start_b"], hw, params["hid_b"],
      mw, params["mix_b"], ew, params["end_b"])
    return out[:, :N, :]


# --------------------------------------------------------------------------------------
# Parameter init (deterministic; stands in for torch.load of the pre-trained TSFormer)
# --------------------------------------------------------------------------------------
def init_linear_params(key, fan_in, fan_out):
    w = jax.random.normal(key, (fan_in, fan_out), jnp.float32) / jnp.sqrt(float(fan_in))
    b = jnp.zeros((1, fan_out), jnp.float32)
    return w, b


def init_step_params(key, *, Lp, D, L, C, H):
    keys = jax.random.split(key, 10)
    p = {}
    # TSFormer (patch embedding + MLP encoder; frozen in the original model)
    p["pe_w"], p["pe_b"] = init_linear_params(keys[0], Lp, D)
    p["mlp1_w"], p["mlp1_b"] = init_linear_params(keys[1], D, D)
    p["mlp2_w"], p["mlp2_b"] = init_linear_params(keys[2], D, D)
    # DiscreteGraphLearning
    p["node_w"], p["node_b"] = init_linear_params(keys[3], D, D)
    p["cat1_w"], p["cat1_b"] = init_linear_params(keys[4], 2 * D, D)
    p["cat2_w"], p["cat2_b"] = init_linear_params(keys[5], D, 2)
    # GraphWaveNet backend (1x1 convs as matmuls)
    p["start_w"], p["start_b"] = init_linear_params(keys[6], L * C, H)
    p["hid_w"], p["hid_b"] = init_linear_params(keys[7], D, H)
    p["mix_w"], p["mix_b"] = init_linear_params(keys[8], 3 * H, H)
    p["end_w"], p["end_b"] = init_linear_params(keys[9], H, L)
    return p


# --------------------------------------------------------------------------------------
# Sub-modules (simplified, hot paths in fused Pallas kernels)
# --------------------------------------------------------------------------------------
def tsformer_pooled_forward(params, long_history, P, Lp, D):
    """long_history: [B, P*Lp, N, 3] -> (mean hidden [B, N, D], last-patch hidden [B, N, D])."""
    B, LP, N, _ = long_history.shape
    x = long_history[..., 0]                                   # [B, P*Lp, N]
    # TODO(synk): patchify relayout kept in XLA (cheap vs the N^2 stages); the full TSFormer
    #             transformer encoder (MHA blocks) is simplified to the fused patch-MLP.
    x = x.reshape(B, P, Lp, N)
    x = jnp.transpose(x, (1, 0, 3, 2)).reshape(P, B * N, Lp)   # [P, B*N, Lp]
    mean_h, last_h = tsformer_pooled(x, params["pe_w"], params["pe_b"],
                                     params["mlp1_w"], params["mlp1_b"],
                                     params["mlp2_w"], params["mlp2_b"])
    return mean_h.reshape(B, N, D), last_h.reshape(B, N, D)


def discrete_graph_learning_forward(params, long_history, P, Lp, D, knn_k=3):
    """Returns (bernoulli_prob [B,N,N], hidden_last [B,N,D], adj_knn [B,N,N], sampled_adj)."""
    B, _, N, _ = long_history.shape
    mean_h, last_h = tsformer_pooled_forward(params, long_history, P, Lp, D)

    # Node representation = last-patch hidden state of the (frozen) TSFormer output.
    fr, fs = node_pair_proj(last_h.reshape(B * N, D), params["node_w"], params["node_b"],
                            params["cat1_w"], params["cat1_b"])
    fr = fr.reshape(B, N, D)
    fs = fs.reshape(B, N, D)

    # Fused pairwise 2-layer head + 2-class softmax -> Bernoulli probability [B, N, N].
    wd = (params["cat2_w"][:, 0] - params["cat2_w"][:, 1]).reshape(D, 1)
    bd = (params["cat2_b"][:, 0] - params["cat2_b"][:, 1]).reshape(1, 1)
    bernoulli_prob = pairwise_bernoulli_prob(fr, fs, wd, bd)            # [B, N, N]

    # TODO(synk): original uses Gumbel-softmax sampling; deterministic softmax prob reused
    #             as sampled_adj (not recomputed).
    sampled_adj = bernoulli_prob

    # kNN guidance graph from mean-pooled node representations (Pallas cosine similarity).
    sim = cosine_similarity(mean_h)                                     # [B, N, N]
    # TODO(synk): top-k has no clean Pallas equivalent; done with lax.top_k in glue.
    kth = jax.lax.top_k(sim, knn_k)[0][..., -1:]                        # [B, N, 1]
    adj_knn = (sim >= kth).astype(jnp.float32)                          # [B, N, N]

    return bernoulli_prob, last_h, adj_knn, sampled_adj


def graph_wavenet_forward(params, short_history, hidden_last, sampled_adj, L):
    """short_history [B,L,N,3], hidden_last [B,N,D], sampled_adj [B,N,N] -> y_hat [B,N,L]."""
    B, Lh, N, C = short_history.shape
    xs = jnp.transpose(short_history, (0, 2, 1, 3)).reshape(B, N, Lh * C)
    # TODO(synk): dilated temporal convolution stack of GraphWaveNet simplified to one layer.
    return graph_wavenet_backend(xs, hidden_last, sampled_adj, params, L)   # [B, N, L]


# --------------------------------------------------------------------------------------
# STEP forward (mirrors the PyTorch STEP.forward)
# --------------------------------------------------------------------------------------
def step_forward(params, history_data, long_history_data, future_data, batch_seen, epoch,
                 *, P, Lp, D):
    short_term_history = history_data
    batch_size, L, num_nodes, _ = short_term_history.shape

    bern_prob, hidden_last, adj_knn, sampled_adj = discrete_graph_learning_forward(
        params, long_history_data, P, Lp, D)

    # Backend output already in [B, N, L] (== PyTorch backend(...).transpose(1, 2)).
    y_hat = graph_wavenet_forward(params, short_term_history, hidden_last,
                                  sampled_adj, L)                        # [B, N, L]

    if epoch is not None:
        gsl_coefficient = 1.0 / (int(epoch / 6) + 1)
    else:
        gsl_coefficient = 0.0

    # bern_prob == softmax(bernoulli_unnorm)[..., 0] reshaped to [B, N, N]; computed once.
    return y_hat[..., None], bern_prob, adj_knn, gsl_coefficient


# --------------------------------------------------------------------------------------
# Demo
# --------------------------------------------------------------------------------------
if __name__ == "__main__":
    B, N, L, C = 2, 8, 12, 3       # batch, nodes, short history length, features
    P, Lp = 2, L                   # long history = P patches of length Lp = L -> [B, L*P, N, 3]
    D, H = 32, 32                  # TSFormer hidden dim, backend hidden dim

    key = jax.random.PRNGKey(0)
    k_param, k_short, k_long, k_future = jax.random.split(key, 4)

    params = init_step_params(k_param, Lp=Lp, D=D, L=L, C=C, H=H)

    history_data = jax.random.normal(k_short, (B, L, N, C), jnp.float32)
    long_history_data = jax.random.normal(k_long, (B, L * P, N, C), jnp.float32)
    future_data = jax.random.normal(k_future, (B, L, N, C), jnp.float32)

    y_hat, bern_prob, adj_knn, gsl = step_forward(
        params, history_data, long_history_data, future_data,
        batch_seen=0, epoch=1, P=P, Lp=Lp, D=D)

    jax.block_until_ready((y_hat, bern_prob, adj_knn))

    assert y_hat.shape == (B, N, L, 1)
    assert bern_prob.shape == (B, N, N)
    assert adj_knn.shape == (B, N, N)
    assert bool(jnp.all(jnp.isfinite(y_hat)))
    assert bool(jnp.all((bern_prob >= 0.0) & (bern_prob <= 1.0)))
    assert abs(gsl - 1.0) < 1e-9

    print("KERNEL_OK")
</pallas_src>

<mosaic_0001>
module attributes {stable_mosaic.version = 11 : i64} {
  func.func @_tsformer_pool_kernel(%arg0: i32, %arg1: i32, %arg2: memref<1x8x12xf32, #tpu.memory_space<vmem>>, %arg3: memref<12x32xbf16, #tpu.memory_space<vmem>>, %arg4: memref<1x32xf32, #tpu.memory_space<vmem>>, %arg5: memref<32x32xbf16, #tpu.memory_space<vmem>>, %arg6: memref<1x32xf32, #tpu.memory_space<vmem>>, %arg7: memref<32x32xbf16, #tpu.memory_space<vmem>>, %arg8: memref<1x32xf32, #tpu.memory_space<vmem>>, %arg9: memref<8x32xf32, #tpu.memory_space<vmem>>, %arg10: memref<8x32xf32, #tpu.memory_space<vmem>>, %arg11: memref<8x32xf32, #tpu.memory_space<vmem>>) attributes {dimension_semantics = [#tpu.dimension_semantics<parallel>, #tpu.dimension_semantics<arbitrary>], iteration_bounds = array<i64: 2, 2>, scalar_prefetch = 0 : i64, scratch_operands = 1 : i64, tpu.core_type = #tpu.core_type<tc>, window_params = [{transform_indices = @transform_0, window_bounds = array<i64: 1, 8, 12>}, {pipeline_mode = #tpu.pipeline_mode<synchronous>, transform_indices = @transform_1, window_bounds = array<i64: 12, 32>}, {pipeline_mode = #tpu.pipeline_mode<synchronous>, transform_indices = @transform_2, window_bounds = array<i64: 1, 32>}, {pipeline_mode = #tpu.pipeline_mode<synchronous>, transform_indices = @transform_3, window_bounds = array<i64: 32, 32>}, {pipeline_mode = #tpu.pipeline_mode<synchronous>, transform_indices = @transform_4, window_bounds = array<i64: 1, 32>}, {pipeline_mode = #tpu.pipeline_mode<synchronous>, transform_indices = @transform_5, window_bounds = array<i64: 32, 32>}, {pipeline_mode = #tpu.pipeline_mode<synchronous>, transform_indices = @transform_6, window_bounds = array<i64: 1, 32>}, {transform_indices = @transform_7, window_bounds = array<i64: 8, 32>}, {transform_indices = @transform_8, window_bounds = array<i64: 8, 32>}]} {
    %c0 = arith.constant 0 : index
    %c0_0 = arith.constant 0 : index
    %c0_1 = arith.constant 0 : index
    %0 = vector.load %arg2[%c0, %c0_0, %c0_1] : memref<1x8x12xf32, #tpu.memory_space<vmem>>, vector<1x8x12xf32>
    %1 = vector.shape_cast %0 : vector<1x8x12xf32> to vector<8x12xf32>
    %2 = arith.truncf %1 : vector<8x12xf32> to vector<8x12xbf16>
    %c0_2 = arith.constant 0 : index
    %c0_3 = arith.constant 0 : index
    %3 = vector.load %arg3[%c0_2, %c0_3] : memref<12x32xbf16, #tpu.memory_space<vmem>>, vector<12x32xbf16>
    %cst = arith.constant dense<0.000000e+00> : vector<8x32xf32>
    %4 = tpu.matmul %2, %3, %cst {dimension_numbers = #tpu.dot_dimension_numbers<[1], [0], [0], [1], [0, 0, 1, 1], [], []>} : vector<8x12xbf16>, vector<12x32xbf16>, vector<8x32xf32> -> vector<8x32xf32>
    %c0_4 = arith.constant 0 : index
    %c0_5 = arith.constant 0 : index
    %5 = vector.load %arg4[%c0_4, %c0_5] : memref<1x32xf32, #tpu.memory_space<vmem>>, vector<1x32xf32>
    %6 = vector.broadcast %5 : vector<1x32xf32> to vector<8x32xf32>
    %7 = arith.addf %4, %6 : vector<8x32xf32>
    %8 = arith.truncf %7 : vector<8x32xf32> to vector<8x32xbf16>
    %c0_6 = arith.constant 0 : index
    %c0_7 = arith.constant 0 : index
    %9 = vector.load %arg5[%c0_6, %c0_7] : memref<32x32xbf16, #tpu.memory_space<vmem>>, vector<32x32xbf16>
    %cst_8 = arith.constant dense<0.000000e+00> : vector<8x32xf32>
    %10 = tpu.matmul %8, %9, %cst_8 {dimension_numbers = #tpu.dot_dimension_numbers<[1], [0], [0], [1], [0, 0, 1, 1], [], []>} : vector<8x32xbf16>, vector<32x32xbf16>, vector<8x32xf32> -> vector<8x32xf32>
    %c0_9 = arith.constant 0 : index
    %c0_10 = arith.constant 0 : index
    %11 = vector.load %arg6[%c0_9, %c0_10] : memref<1x32xf32, #tpu.memory_space<vmem>>, vector<1x32xf32>
    %12 = vector.broadcast %11 : vector<1x32xf32> to vector<8x32xf32>
    %13 = arith.addf %10, %12 : vector<8x32xf32>
    %cst_11 = arith.constant 0.000000e+00 : f32
    %14 = vector.broadcast %cst_11 : f32 to vector<8x32xf32>
    %15 = arith.maximumf %13, %14 : vector<8x32xf32>
    %16 = arith.truncf %15 : vector<8x32xf32> to vector<8x32xbf16>
    %c0_12 = arith.constant 0 : index
    %c0_13 = arith.constant 0 : index
    %17 = vector.load %arg7[%c0_12, %c0_13] : memref<32x32xbf16, #tpu.memory_space<vmem>>, vector<32x32xbf16>
    %cst_14 = arith.constant dense<0.000000e+00> : vector<8x32xf32>
    %18 = tpu.matmul %16, %17, %cst_14 {dimension_numbers = #tpu.dot_dimension_numbers<[1], [0], [0], [1], [0, 0, 1, 1], [], []>} : vector<8x32xbf16>, vector<32x32xbf16>, vector<8x32xf32> -> vector<8x32xf32>
    %c0_15 = arith.constant 0 : index
    %c0_16 = arith.constant 0 : index
    %19 = vector.load %arg8[%c0_15, %c0_16] : memref<1x32xf32, #tpu.memory_space<vmem>>, vector<1x32xf32>
    %20 = vector.broadcast %19 : vector<1x32xf32> to vector<8x32xf32>
    %21 = arith.addf %18, %20 : vector<8x32xf32>
    %c0_i32 = arith.constant 0 : i32
    %22 = arith.cmpi eq, %arg1, %c0_i32 : i32
    %23 = arith.extui %22 : i1 to i32
    %c0_i32_17 = arith.constant 0 : i32
    %24 = arith.cmpi ne, %23, %c0_i32_17 : i32
    scf.if %24 {
      %cst_23 = arith.constant 0.000000e+00 : f32
      %31 = vector.broadcast %cst_23 : f32 to vector<8x32xf32>
      %c0_24 = arith.constant 0 : index
      %c0_25 = arith.constant 0 : index
      %32 = vector.load %arg11[%c0_24, %c0_25] : memref<8x32xf32, #tpu.memory_space<vmem>>, vector<8x32xf32>
      tpu.vector_store %arg11[%c0_24, %c0_25], %31 {strides = array<i32>} : memref<8x32xf32, #tpu.memory_space<vmem>>, vector<8x32xf32>,
    } else {
    }
    %c0_18 = arith.constant 0 : index
    %c0_19 = arith.constant 0 : index
    %25 = vector.load %arg11[%c0_18, %c0_19] : memref<8x32xf32, #tpu.memory_space<vmem>>, vector<8x32xf32>
    %26 = arith.addf %25, %21 : vector<8x32xf32>
    %c0_20 = arith.constant 0 : index
    %c0_21 = arith.constant 0 : index
    %27 = vector.load %arg11[%c0_20, %c0_21] : memref<8x32xf32, #tpu.memory_space<vmem>>, vector<8x32xf32>
    tpu.vector_store %arg11[%c0_20, %c0_21], %26 {strides = array<i32>} : memref<8x32xf32, #tpu.memory_space<vmem>>, vector<8x32xf32>,
    %c1_i32 = arith.constant 1 : i32
    %28 = arith.cmpi eq, %arg1, %c1_i32 : i32
    %29 = arith.extui %28 : i1 to i32
    %c0_i32_22 = arith.constant 0 : i32
    %30 = arith.cmpi ne, %29, %c0_i32_22 : i32
    scf.if %30 {
      %c0_23 = arith.constant 0 : index
      %c0_24 = arith.constant 0 : index
      %31 = vector.load %arg11[%c0_23, %c0_24] : memref<8x32xf32, #tpu.memory_space<vmem>>, vector<8x32xf32>
      %cst_25 = arith.constant 5.000000e-01 : f32
      %32 = vector.broadcast %cst_25 : f32 to vector<8x32xf32>
      %33 = arith.mulf %31, %32 : vector<8x32xf32>
      %c0_26 = arith.constant 0 : index
      %c0_27 = arith.constant 0 : index
      %34 = vector.load %arg9[%c0_26, %c0_27] : memref<8x32xf32, #tpu.memory_space<vmem>>, vector<8x32xf32>
      tpu.vector_store %arg9[%c0_26, %c0_27], %33 {strides = array<i32>} : memref<8x32xf32, #tpu.memory_space<vmem>>, vector<8x32xf32>,
      %c0_28 = arith.constant 0 : index
      %c0_29 = arith.constant 0 : index
      %35 = vector.load %arg10[%c0_28, %c0_29] : memref<8x32xf32, #tpu.memory_space<vmem>>, vector<8x32xf32>
      tpu.vector_store %arg10[%c0_28, %c0_29], %21 {strides = array<i32>} : memref<8x32xf32, #tpu.memory_space<vmem>>, vector<8x32xf32>,
    } else {
    }
    return
  }
  func.func @transform_0(%arg0: i32, %arg1: i32) -> (i32, i32, i32) {
    %c0_i32 = arith.constant 0 : i32
    %c0_i32_0 = arith.constant 0 : i32
    return %arg1, %arg0, %c0_i32 : i32, i32, i32
  }
  func.func @transform_1(%arg0: i32, %arg1: i32) -> (i32, i32) {
    %c0_i32 = arith.constant 0 : i32
    %c0_i32_0 = arith.constant 0 : i32
    %c0_i32_1 = arith.constant 0 : i32
    return %c0_i32, %c0_i32_0 : i32, i32
  }
  func.func @transform_2(%arg0: i32, %arg1: i32) -> (i32, i32) {
    %c0_i32 = arith.constant 0 : i32
    %c0_i32_0 = arith.constant 0 : i32
    %c0_i32_1 = arith.constant 0 : i32
    return %c0_i32, %c0_i32_0 : i32, i32
  }
  func.func @transform_3(%arg0: i32, %arg1: i32) -> (i32, i32) {
    %c0_i32 = arith.constant 0 : i32
    %c0_i32_0 = arith.constant 0 : i32
    %c0_i32_1 = arith.constant 0 : i32
    return %c0_i32, %c0_i32_0 : i32, i32
  }
  func.func @transform_4(%arg0: i32, %arg1: i32) -> (i32, i32) {
    %c0_i32 = arith.constant 0 : i32
    %c0_i32_0 = arith.constant 0 : i32
    %c0_i32_1 = arith.constant 0 : i32
    return %c0_i32, %c0_i32_0 : i32, i32
  }
  func.func @transform_5(%arg0: i32, %arg1: i32) -> (i32, i32) {
    %c0_i32 = arith.constant 0 : i32
    %c0_i32_0 = arith.constant 0 : i32
    %c0_i32_1 = arith.constant 0 : i32
    return %c0_i32, %c0_i32_0 : i32, i32
  }
  func.func @transform_6(%arg0: i32, %arg1: i32) -> (i32, i32) {
    %c0_i32 = arith.constant 0 : i32
    %c0_i32_0 = arith.constant 0 : i32
    %c0_i32_1 = arith.constant 0 : i32
    return %c0_i32, %c0_i32_0 : i32, i32
  }
  func.func @transform_7(%arg0: i32, %arg1: i32) -> (i32, i32) {
    %c0_i32 = arith.constant 0 : i32
    %c0_i32_0 = arith.constant 0 : i32
    return %arg0, %c0_i32 : i32, i32
  }
  func.func @transform_8(%arg0: i32, %arg1: i32) -> (i32, i32) {
    %c0_i32 = arith.constant 0 : i32
    %c0_i32_0 = arith.constant 0 : i32
    return %arg0, %c0_i32 : i32, i32
  }
}

</mosaic_0001>

<bundles_post_ra>
// kernel: tpu_custom_call.1
= control target key start
LH: loop header
LB: loop body
LE: loop exit
PB: predicated region body
PF: predicated region fallthrough
CT: control target
= control target key end

     0   :  { %s1088_s0 = inlined_call_operand.vmem [shape: f32[2,16,12], index: 0, kind: input, shape index: {}]   ;;  %s1089_s1 = inlined_call_operand.vmem [shape: bf16[12,32], index: 1, kind: input, shape index: {}]   ;;  %s1090_s2 = inlined_call_operand.vmem [shape: f32[1,32], index: 2, kind: input, shape index: {}]   ;;  %s1091_s3 = inlined_call_operand.vmem [shape: bf16[32,32], index: 3, kind: input, shape index: {}]   ;;  %s1092_s4 = inlined_call_operand.vmem [shape: f32[1,32], index: 4, kind: input, shape index: {}]   ;;  %s1093_s5 = inlined_call_operand.vmem [shape: bf16[32,32], index: 5, kind: input, shape index: {}]   ;;  %s1094_s6 = inlined_call_operand.vmem [shape: f32[1,32], index: 6, kind: input, shape index: {}]   ;;  %s1095_s7 = inlined_call_operand.hbm [shape: f32[16,32], index: 7, kind: output, shape index: {0}]   ;;  %s1096_s8 = inlined_call_operand.hbm [shape: f32[16,32], index: 8, kind: output, shape index: {1}]  }
   0x1   :  { %1099 = sst [smem:[#allocation12_spill]] %s1088_s0 }
   0x2   :  { %1100 = sst [smem:[#allocation13_spill]] %s1089_s1 }
   0x3   :  { %1101 = sst [smem:[#allocation14_spill]] %s1090_s2 }
   0x4   :  { %14 = vsyncpa [#allocation4], 0 }
   0x5   :  { %16 = vsyncpa [#allocation4 + $0x1], 0 }
   0x6   :  { %17 = vsyncpa [#allocation6], 0 }
   0x7   :  { %19 = vsyncpa [#allocation6 + $0x1], 0  ;;  %s908_s27 = smov 0   ;;  %s910_s28 = smov 0  }
   0x8   :  { %s912_s29 = smov 0   ;;  %s914_s30 = smov 0  }
   0x9   :  { %s916_s9 = smov 0   ;;  %s918_s10 = smov 0  }
   0xa   :  { %s920_s11 = smov 0   ;;  %s922_s12 = smov 0  }
   0xb LB: > { %1102 = sst [smem:[#allocation9_spill]] %s856_s11  ;;  %s609_s13 = sadd.s32 4294967295, %s860_s12   ;;  %s860_s12 = sphi %s922_s12, %s25_s12   ;;  %s856_s11 = sphi %s920_s11, %s1114_s11   ;;  %s852_s10 = sphi %s918_s10, %s1119_s10   ;;  %s848_s9 = sphi %s916_s9, %s1112_s9   ;;  %s844_s30 = sphi %s914_s30, %s1118_s30   ;;  %s840_s29 = sphi %s912_s29, %s1117_s29   ;;  %s836_s28 = sphi %s910_s28, %s1116_s28   ;;  %s832_s27 = sphi %s908_s27, %s1115_s27  }
   0xc   : > { %s610_s14 = sadd.s32 4294967294, %s860_s12   ;;  %s34_s15 = sadd.s32 1, %s852_s10 }
   0xd   : > { %p35_p0 = scmp.ge.s32.totalorder %s34_s15, 2  ;;  %s37_s16 = sadd.s32 1, %s856_s11 }
   0xe   : > { %p208_p1 = scmp.ne.s32.totalorder %s840_s29, %s836_s28  ;;  %p209_p2 = scmp.eq.s32.totalorder %s609_s13, 3 }
   0xf   : > { %s1121_s15 = smov (%p35_p0, %s34_s15), 0  ;;  %s1123_s16 = smov (!%p35_p0, %s37_s16), %s856_s11 }
  0x10   : > { %1103 = sst [smem:[#allocation10_spill]] %s1121_s15  ;;  %p957_p3 = por %p209_p2, %p208_p1 }
  0x11   : > { %p214_p4 = scmp.ne.s32.totalorder %s836_s28, %s832_s27  ;;  %p39_p5 = scmp.ge.s32.totalorder %s1123_s16, 2 }
  0x12   : > { %p215_p6 = scmp.eq.s32.totalorder %s610_s14, 3  ;;  %p613_p7 = scmp.ge.s32.totalorder %s860_s12, 1 }
  0x13   : > { %p288_p8 = scmp.lt.s32.totalorder %s860_s12, 5  ;;  %s1125_s16 = smov (%p39_p5, %s1123_s16), 0 }
  0x14   : > { %1105 = sst [smem:[#allocation11_spill]] %s1125_s16  ;;  %p967_p9 = por %p215_p6, %p214_p4 }
  0x15   : > { %p289_p10 = pnand %p613_p7, %p288_p8  ;;  %s195_s19 = ssub.s32 %s856_s11, %s1125_s16 }
  0x16   : > { %s198_s20 = sadd.s32 1, %s840_s29  ;;  %p196_p11 = scmp.eq.s32.totalorder %s195_s19, 0 }
  0x17   : > { %292 = sbr.rel (%p289_p10) target bundleno = 491 (0x1eb), region = 48  ;;  %s978_s22 = sand.u32 (!%p289_p10), 1, %s836_s28  }
  0x18   : > { %s975_s21 = scalar_select %p196_p11, %s840_s29, %s198_s20  }
  0x19   : > { %s1107_s1 = sld [smem:[#allocation13_spill]] (!%p289_p10)  ;;  %p330_p12 = scmp.lt.s32.totalorder (!%p289_p10), %s844_s30, 1 }
  0x1a   : > { %p332_p13 = scmp.lt.s32.totalorder (!%p289_p10), %s848_s9, 1  ;;  %s1108_s0 = sld [smem:[#allocation12_spill]] (!%p289_p10) }
  0x1b   : > { %s1109_s2 = sld [smem:[#allocation14_spill]] (!%p289_p10)  ;;  %s1110_s25 = sshll.u32 (!%p289_p10), %s978_s22, 3 }
  0x1c   : > { %vm356_vm0 = vcmask 1045504   ;;  %v651_v3 = vld [vmem:[%s1091_s3 + $0x8] sm:$0xff]  ;;  %s331_s20 = scalar_select %p330_p12, %s844_s30, 1  ;;  %vm352_vm1 = vcmask 97280   ;;  %v650_v7 = vld [vmem:[%s1091_s3] sm:$0xff]  ;;  %vm394_vm2 = vcmask 261120  }
  0x1d   : > { %404 = vmatpush.bf16.msra.mxu1 %v651_v3  ;;  %s333_s24 = scalar_select %p332_p13, %s848_s9, 1  ;;  %v653_v13 = vld [vmem:[%s1093_s5 + $0x8] sm:$0xff]  ;;  %v652_v14 = vld [vmem:[%s1093_s5] sm:$0xff] }
  0x1e   : > { %s616_s23 = sshll.u32 %s331_s20, 1  ;;  %442 = vmatpush.bf16.msra.mxu2 %v653_v13  ;;  %v732_v15 = vld [vmem:[%s1092_s4] ss:$0 sm:$0xff]  ;;  %s1111_s14 = smov %s1110_s25 }
  0x1f   : > { %v620_v0 = vld [vmem:[%s1107_s1] sm:$0xf]  ;;  %v649_v1 = vld [vmem:[%s1107_s1] sm:$0x30]  ;;  %s335_s16 = sadd.s32 %s616_s23, %s333_s24  ;;  %s1021_s19 = scalar_lea.vmem [#allocation5], %s1111_s14 }
  0x20   : > { %v621_v2 = vor.u32 %v649_v1, %v620_v0  ;;  %s617_s15 = sshll.u32 %s335_s16, 3  ;;  %v733_v21 = vld [vmem:[%s1094_s6] ss:$0 sm:$0xff]  ;;  %p641_p0 = scmp.ne.s32.totalorder %s844_s30, 0 }
  0x21   : > { %s337_s26 = scalar_lea.vmem %s1108_s0, %s617_s15  ;;  %405 = vmatpush.bf16.msra.mxu1 %v650_v7  ;;  %v731_v8 = vld [vmem:[%s1109_s2] ss:$0 sm:$0xff] }
  0x22   : > { %v358_v4 = vsel %vm356_vm0, %v621_v2, 0  ;;  %v339_v5 = vld [vmem:[%s337_s26] sm:$0xff]  ;;  %443 = vmatpush.bf16.msra.mxu2 %v652_v14  ;;  %s322_s26 = scalar_lea.vmem [#allocation3], %s1110_s25 }
  0x23   : > { %367 = vmatpush.bf16.msra.mxu0 %v358_v4  ;;  %v340_v6 = vpack.c.bf16 %v339_v5, %v339_v5 }
  0x26   : > { %622 = vmatmul.msk.bf16.vlgmr.msra.gmra.mxu0 %vm352_vm1, %v340_v6 }
  0xa3   : > { %v369_v9 = vpop.f32.mrf.mxu0 }
  0xa4   : > { %v370_v10 = vadd.f32 %v731_v8, %v369_v9 }
  0xa6   : > { %v373_v11 = vpack.c.bf16 %v370_v10, %v370_v10 }
  0xa8   : > { %631 = vmatmul.msk.bf16.vlgmr.msra.gmra.mxu1 %vm394_vm2, %v373_v11 }
  0xab   : > { %v371_v12 = vpop.f32.mrf.mxu0 }
 0x125   : > { %v407_v16 = vpop.f32.mrf.mxu1 }
 0x126   : > { %v408_v17 = vadd.f32 %v732_v15, %v407_v16 }
 0x128   : > { %v411_v18 = vmax.f32 %v408_v17, 0.0 }
 0x12a   : > { %v412_v19 = vpack.c.bf16 %v411_v18, %v411_v18 }
 0x12c   : > { %640 = vmatmul.msk.bf16.vlgmr.msra.gmra.mxu2 %vm394_vm2, %v412_v19 }
 0x12d   : > { %v409_v20 = vpop.f32.mrf.mxu1 }
 0x1af   : > { %v445_v22 = vpop.f32.mrf.mxu2 }
 0x1b0   : > { %v446_v23 = vadd.f32 %v733_v21, %v445_v22 }
 0x1b3   : > { %452 = sbr.rel (%p641_p0) target bundleno = 442 (0x1ba), region = 52 }
 0x1b7   : > { %v447_v24 = vpop.f32.mrf.mxu2 }
 0x1b8   : > { %v862_v25 = vmov 0.0  }
 0x1b9   : > { %453 = vst.msk [vmem:[#allocation2] sm:$0xff] %vm394_vm2, %v862_v25 }
 0x1ba PF: > { %p642_p1 = scmp.ne.s32.totalorder %s844_s30, 1 }
 0x1bf   : > { %460 = sbr.rel (%p642_p1) target bundleno = 462 (0x1ce), region = 56 }
 0x1c0   : > { %v454_v26 = vld [vmem:[#allocation2] sm:$0xff] }
 0x1c1   : > { %v455_v27 = vadd.f32 %v454_v26, %v446_v23 }
 0x1c3   : > { %456 = vst.msk [vmem:[#allocation2] sm:$0xff] %vm394_vm2, %v455_v27 }
 0x1c4   : > { %464 = vst.msk [vmem:[%s1021_s19] sm:$0xff] %vm394_vm2, %v446_v23 }
 0x1ca   : > { %v461_v28 = vld [vmem:[#allocation2] sm:$0xff] }
 0x1cb   : > { %v462_v29 = vmul.f32 0.5, %v461_v28 }
 0x1cd   : > { %463 = vst.msk [vmem:[%s322_s26] sm:$0xff] %vm394_vm2, %v462_v29 }
 0x1ce PF: > { %s645_s11 = sshll.u32 %s848_s9, 3  ;;  %s483_s1 = sshll.u32 %s322_s26, 4  ;;  %s484_s1 = int_to_ptr.vmem [resolvable:$true] %s483_s1 }
 0x1cf   : > { %s481_s13 = scalar_lea.hbm %s1095_s7, %s645_s11  ;;  %s466_s20 = scalar_lea.sflag [#allocation4], %s978_s22 }
 0x1d0   : > { %s485_s30 = sshll.u32 %s481_s13, 4  ;;  %s754_s9 = scalar_lea.hbm %s1095_s7, 16  ;;  %s486_s30 = int_to_ptr.hbm [resolvable:$true] %s485_s30 }
 0x1d1   : > { %s748_s23 = sshra.s32 %s486_s30, 4  ;;  %s749_s23 = int_to_ptr.hbm [resolvable:$true] %s748_s23 }
 0x1d2   : > { %s750_s24 = scalar_lea.hbm %s749_s23, 8  ;;  %p755_p6 = scmp.lt.s32.totalorder %s749_s23, %s1095_s7 }
 0x1d3   : > { %p751_p2 = scmp.ne.s32.totalorder %s749_s23, %s750_s24  ;;  %p756_p7 = scmp.lt.s32.totalorder %s754_s9, %s750_s24 }
 0x1d5   : > { %p752_p4 = pnand %p751_p2, %p957_p3  ;;  %p757_p8 = por %p756_p7, %p755_p6 }
 0x1d7   : > { %p753_p5 = pneg %p752_p4 }
 0x1d9   : > { %p758_p10 = pnand %p757_p8, %p753_p5 }
 0x1db   : > { %761 = shalt.err (!%p758_p10)
}
 0x1dc   : > { %654 = dma.vmem_to_hbm [thread:$0]  (%p957_p3), %s484_s1, 128, %s486_s30, %s466_s20  }
 0x1dd   : > { %s495_s16 = scalar_lea.hbm %s1096_s8, %s645_s11  ;;  %s497_s13 = sshll.u32 %s1021_s19, 4  ;;  %s498_s13 = int_to_ptr.vmem [resolvable:$true] %s497_s13 }
 0x1de   : > { %s499_s25 = sshll.u32 %s495_s16, 4  ;;  %s471_s0 = scalar_lea.sflag [#allocation6], %s978_s22  ;;  %s500_s25 = int_to_ptr.hbm [resolvable:$true] %s499_s25 }
 0x1df   : > { %s776_s2 = sshra.s32 %s500_s25, 4  ;;  %s782_s1 = scalar_lea.hbm %s1096_s8, 16  ;;  %s777_s2 = int_to_ptr.hbm [resolvable:$true] %s776_s2 }
 0x1e0   : > { %s778_s23 = scalar_lea.hbm %s777_s2, 8  ;;  %p783_p0 = scmp.lt.s32.totalorder %s777_s2, %s1096_s8 }
 0x1e1   : > { %p779_p11 = scmp.ne.s32.totalorder %s777_s2, %s778_s23  ;;  %p784_p1 = scmp.lt.s32.totalorder %s782_s1, %s778_s23 }
 0x1e3   : > { %p780_p12 = pnand %p779_p11, %p957_p3  ;;  %p785_p2 = por %p784_p1, %p783_p0 }
 0x1e5   : > { %p781_p13 = pneg %p780_p12 }
 0x1e7   : > { %p786_p4 = pnand %p785_p2, %p781_p13 }
 0x1e9   : > { %789 = shalt.err (!%p786_p4)
}
 0x1ea   : > { %655 = dma.vmem_to_hbm [thread:$0]  (%p957_p3), %s498_s13, 128, %s500_s25, %s471_s0  }
 0x1eb PF: > { %p665_p5 = scmp.ge.s32.totalorder %s860_s12, 2  ;;  %s511_s22 = sand.u32 1, %s832_s27  }
 0x1ec   : > { %s512_s19 = scalar_lea.sflag [#allocation4], %s511_s22 }
 0x1ed   : > { %p659_p6 = pnand %p665_p5, %p967_p9 }
 0x1ef   : > { %p660_p7 = pneg %p659_p6 }
 0x1f1   : > { %823 = dma.done.wait (%p660_p7), %s512_s19, 128  }
 0x1f2   : > { %825 = vsyncadd (%p660_p7), %s512_s19, 4294967168  ;;  %s522_s11 = scalar_lea.sflag [#allocation6], %s511_s22 }
 0x1f3   : > { %827 = dma.done.wait (%p660_p7), %s522_s11, 128  }
 0x1f4   : > { %829 = vsyncadd (%p660_p7), %s522_s11, 4294967168  ;;  %s25_s12 = sadd.s32 1, %s860_s12   ;;  %s1112_s9 = sld [smem:[#allocation9_spill]] }
 0x1f5   : > { %p22_p8 = scmp.ge.s32.totalorder %s25_s12, 6   ;;  %s1113_s17 = sld [smem:[#allocation10_spill]] }
 0x1f6   : > { %s1114_s11 = sld [smem:[#allocation11_spill]]  ;;  %s1115_s27 = smov %s836_s28 }
 0x1f7   : > { %s1116_s28 = smov %s840_s29  ;;  %s1117_s29 = smov %s975_s21 }
 0x1f8   : > { %s1118_s30 = smov %s852_s10  ;;  %24 = sbr.rel (!%p22_p8) target bundleno = 11 (0xb), region = 108 }
 0x1fb   : > { %s1119_s10 = smov %s1113_s17 }
 0x1fd   :  { %528 = vsyncpa [#allocation4], 1 }
 0x1fe   :  { %530 = vsyncpa [#allocation4 + $0x1], 1 }
 0x1ff   :  { %531 = vsyncpa [#allocation6], 1 }
 0x200   :  { %533 = vsyncpa [#allocation6 + $0x1], 1 }

</bundles_post_ra>
